<compile_context>
chip_gen: v7x
topology: tpu7x:2x2x1
jax: 0.10.0
libtpu: 0.0.40
codegen_flags: <defaults>
</compile_context>

<pallas_src>
import jax
import jax.numpy as jnp
from jax.experimental import pallas as pl
from jax.experimental.pallas import tpu as pltpu


def _round_up(x, m):
    return (x + m - 1) // m * m


def _make_class_head_kernel(hw_sizes, offsets):
    """Build the fused kernel for `len(hw_sizes)` FPN levels."""
    num_levels = len(hw_sizes)

    def kernel(*refs):
        x_refs = refs[:num_levels]          # level j: (1, C, HW_j), compute dtype
        w_ref = refs[num_levels]            # (L, OC, C)  all levels' weights
        b_ref = refs[num_levels + 1]        # (L, OC, 1)  f32 biases
        o_ref = refs[num_levels + 2]        # (1, OC, S_padded)

        # Static Python loop over FPN levels: one grid step (= one batch item)
        # computes every level.  No per-level grid steps, no pl.when chain.
        for j in range(num_levels):
            x = x_refs[j][0]                # (C, HW_j); lane axis = HW_j
            w = w_ref[j]                    # (OC, C)
            b = b_ref[j]                    # (OC, 1), float32
            # 1x1 conv == matmul; f32 accumulation on the MXU, f32 bias add.
            y = jnp.dot(w, x, preferred_element_type=jnp.float32) + b
            # offsets[j] is a static, 128-aligned constant -> lane-aligned store.
            o_ref[0, :, pl.ds(offsets[j], hw_sizes[j])] = y.astype(o_ref.dtype)

    return kernel


def class_head_fused(xs_flat, w_stack, b_stack):
    """Fused 1x1-conv over all FPN levels.

    xs_flat: list of (N, C, HW_j) activations (NCHW with spatial flattened).
    w_stack: (L, OC, C) per-level conv weights.
    b_stack: (L, OC, 1) per-level biases (float32).
    returns: ((N, OC, S_padded) float32, per-level 128-aligned offsets, hw sizes).
    """
    num_levels = len(xs_flat)
    N, C = xs_flat[0].shape[:2]
    OC = w_stack.shape[1]
    hw_sizes = tuple(int(x.shape[2]) for x in xs_flat)

    # 128-lane-aligned per-level output slots; padding is sliced off in the
    # wrapper (padded columns are never initialized).
    slots = tuple(_round_up(hw, 128) for hw in hw_sizes)
    offsets = tuple(int(sum(slots[:j])) for j in range(num_levels))
    total_padded = int(sum(slots))

    kernel = _make_class_head_kernel(hw_sizes, offsets)

    # All blocks are full along their last two dims, so no (8,128) divisibility
    # requirements and no tail handling is needed for arbitrary H*W / N.
    in_specs = [pl.BlockSpec((1, C, hw), lambda n: (n, 0, 0)) for hw in hw_sizes]
    in_specs.append(pl.BlockSpec((num_levels, OC, C), lambda n: (0, 0, 0)))  # weights
    in_specs.append(pl.BlockSpec((num_levels, OC, 1), lambda n: (0, 0, 0)))  # biases

    out = pl.pallas_call(
        kernel,
        out_shape=jax.ShapeDtypeStruct((N, OC, total_padded), jnp.float32),
        grid=(N,),
        in_specs=in_specs,
        out_specs=pl.BlockSpec((1, OC, total_padded), lambda n: (n, 0, 0)),
        compiler_params=pltpu.CompilerParams(
            dimension_semantics=("parallel",)),
    )(*xs_flat, w_stack, b_stack)
    return out, offsets, hw_sizes


class ClassHeadPallas:
    """JAX/Pallas re-implementation of RetinaFace ClassHead."""

    def __init__(self, in_channels=64, num_anchors=2, num_classes=2,
                 fpn_num=3, key=None, compute_dtype=jnp.bfloat16):
        self.in_channels = in_channels
        self.num_anchors = num_anchors
        self.num_classes = num_classes
        self.fpn_num = fpn_num
        self.out_channels = num_anchors * num_classes
        self.compute_dtype = compute_dtype
        if key is None:
            key = jax.random.PRNGKey(42)
        self.weights = []   # list of (OC, C); PyTorch Conv2d weight is (OC, C, 1, 1)
        self.biases = []    # list of (OC,)
        for _ in range(fpn_num):
            kw, kb, key = jax.random.split(key, 3)
            self.weights.append(0.02 * jax.random.normal(
                kw, (self.out_channels, in_channels), dtype=jnp.float32))
            self.biases.append(0.02 * jax.random.normal(
                kb, (self.out_channels,), dtype=jnp.float32))

    def __call__(self, features_nchw):
        N = features_nchw[0].shape[0]
        # NCHW -> (N, C, H*W): pure reshape, no transpose / copy of activations.
        xs_flat = [
            f.reshape(f.shape[0], f.shape[1], -1).astype(self.compute_dtype)
            for f in features_nchw
        ]
        w_stack = jnp.stack(self.weights).astype(self.compute_dtype)        # (L, OC, C)
        b_stack = jnp.stack(self.biases)[:, :, None].astype(jnp.float32)    # (L, OC, 1)

        out, offsets, hw_sizes = class_head_fused(xs_flat, w_stack, b_stack)

        # Per level: drop the lane padding, (N, OC, HW) -> (N, HW, OC) ->
        # (N, HW*A, num_classes); then concat.  This is exactly
        # cat([conv(x).permute(0,2,3,1).view(N, -1, 2)], dim=1) and only
        # touches the tiny output tensor (layout plumbing, not compute).
        pieces = []
        for off, hw in zip(offsets, hw_sizes):
            y = out[:, :, off:off + hw]                      # valid columns only
            y = jnp.transpose(y, (0, 2, 1)).reshape(
                N, hw * self.num_anchors, self.num_classes)
            pieces.append(y)
        return jnp.concatenate(pieces, axis=1)


def _reference(features_nchw, weights, biases):
    outs = []
    for feat, w, b in zip(features_nchw, weights, biases):
        N = feat.shape[0]
        y = jnp.einsum("nchw,oc->nohw", feat, w) + b[None, :, None, None]
        y = jnp.transpose(y, (0, 2, 3, 1)).reshape(N, -1, 2)
        outs.append(y)
    return jnp.concatenate(outs, axis=1)


if __name__ == "__main__":
    key = jax.random.PRNGKey(0)
    N, C = 2, 64
    num_anchors, num_classes, fpn_num = 2, 2, 3
    spatial = [16, 8, 4]  # three FPN levels

    feats = []
    for s in spatial:
        key, sub = jax.random.split(key)
        feats.append(jax.random.normal(sub, (N, C, s, s), dtype=jnp.float32))

    # f32 path: tight check against the pure-JAX reference.
    head_f32 = ClassHeadPallas(in_channels=C, num_anchors=num_anchors,
                               num_classes=num_classes, fpn_num=fpn_num,
                               key=jax.random.PRNGKey(1),
                               compute_dtype=jnp.float32)
    out_f32 = jax.block_until_ready(head_f32(feats))

    ref = _reference(feats, head_f32.weights, head_f32.biases)
    expected_anchors = sum(s * s * num_anchors for s in spatial)
    assert out_f32.shape == (N, expected_anchors, num_classes), out_f32.shape
    assert jnp.allclose(out_f32, ref, atol=2e-3, rtol=2e-3), "f32 mismatch vs reference"

    # Default bf16 path (halves HBM read traffic; f32 MXU accumulate, f32 bias).
    head = ClassHeadPallas(in_channels=C, num_anchors=num_anchors,
                           num_classes=num_classes, fpn_num=fpn_num,
                           key=jax.random.PRNGKey(1))
    head.weights = head_f32.weights
    head.biases = head_f32.biases
    out = jax.block_until_ready(head(feats))
    assert out.shape == (N, expected_anchors, num_classes), out.shape
    assert jnp.allclose(out, ref, atol=1e-2, rtol=1e-2), "bf16 mismatch vs reference"

    print("KERNEL_OK")
</pallas_src>

<mosaic_0001>
module attributes {stable_mosaic.version = 11 : i64} {
  func.func @kernel(%arg0: i32, %arg1: memref<1x64x256xf32, #tpu.memory_space<vmem>>, %arg2: memref<1x64x64xf32, #tpu.memory_space<vmem>>, %arg3: memref<1x64x16xf32, #tpu.memory_space<vmem>>, %arg4: memref<3x4x64xf32, #tpu.memory_space<vmem>>, %arg5: memref<3x4x1xf32, #tpu.memory_space<vmem>>, %arg6: memref<1x4x512xf32, #tpu.memory_space<vmem>>) attributes {dimension_semantics = [#tpu.dimension_semantics<parallel>], iteration_bounds = array<i64: 2>, scalar_prefetch = 0 : i64, scratch_operands = 0 : i64, tpu.core_type = #tpu.core_type<tc>, window_params = [{transform_indices = @transform_0, window_bounds = array<i64: 1, 64, 256>}, {transform_indices = @transform_1, window_bounds = array<i64: 1, 64, 64>}, {transform_indices = @transform_2, window_bounds = array<i64: 1, 64, 16>}, {pipeline_mode = #tpu.pipeline_mode<synchronous>, transform_indices = @transform_3, window_bounds = array<i64: 3, 4, 64>}, {pipeline_mode = #tpu.pipeline_mode<synchronous>, transform_indices = @transform_4, window_bounds = array<i64: 3, 4, 1>}, {transform_indices = @transform_5, window_bounds = array<i64: 1, 4, 512>}]} {
    %c0 = arith.constant 0 : index
    %c0_0 = arith.constant 0 : index
    %c0_1 = arith.constant 0 : index
    %0 = vector.load %arg1[%c0, %c0_0, %c0_1] : memref<1x64x256xf32, #tpu.memory_space<vmem>>, vector<1x64x256xf32>
    %1 = vector.shape_cast %0 : vector<1x64x256xf32> to vector<64x256xf32>
    %c0_2 = arith.constant 0 : index
    %c0_3 = arith.constant 0 : index
    %c0_4 = arith.constant 0 : index
    %2 = vector.load %arg4[%c0_2, %c0_3, %c0_4] : memref<3x4x64xf32, #tpu.memory_space<vmem>>, vector<1x4x64xf32>
    %3 = vector.shape_cast %2 : vector<1x4x64xf32> to vector<4x64xf32>
    %c0_5 = arith.constant 0 : index
    %c0_6 = arith.constant 0 : index
    %c0_7 = arith.constant 0 : index
    %4 = vector.load %arg5[%c0_5, %c0_6, %c0_7] : memref<3x4x1xf32, #tpu.memory_space<vmem>>, vector<1x4x1xf32>
    %5 = vector.shape_cast %4 : vector<1x4x1xf32> to vector<4x1xf32>
    %cst = arith.constant dense<0.000000e+00> : vector<4x256xf32>
    %6 = tpu.matmul %3, %1, %cst {dimension_numbers = #tpu.dot_dimension_numbers<[1], [0], [0], [1], [0, 0, 1, 1], [], []>} : vector<4x64xf32>, vector<64x256xf32>, vector<4x256xf32> -> vector<4x256xf32>
    %7 = vector.broadcast %5 : vector<4x1xf32> to vector<4x256xf32>
    %8 = arith.addf %6, %7 : vector<4x256xf32>
    %c0_8 = arith.constant 0 : index
    %c0_9 = arith.constant 0 : index
    %c0_10 = arith.constant 0 : index
    %9 = vector.load %arg6[%c0_8, %c0_9, %c0_10] : memref<1x4x512xf32, #tpu.memory_space<vmem>>, vector<1x4x256xf32>
    %10 = vector.shape_cast %9 : vector<1x4x256xf32> to vector<4x256xf32>
    %11 = vector.shape_cast %8 : vector<4x256xf32> to vector<1x4x256xf32>
    tpu.vector_store %arg6[%c0_8, %c0_9, %c0_10], %11 {strides = array<i32>} : memref<1x4x512xf32, #tpu.memory_space<vmem>>, vector<1x4x256xf32>,
    %c0_11 = arith.constant 0 : index
    %c0_12 = arith.constant 0 : index
    %c0_13 = arith.constant 0 : index
    %12 = vector.load %arg2[%c0_11, %c0_12, %c0_13] : memref<1x64x64xf32, #tpu.memory_space<vmem>>, vector<1x64x64xf32>
    %13 = vector.shape_cast %12 : vector<1x64x64xf32> to vector<64x64xf32>
    %c1 = arith.constant 1 : index
    %c0_14 = arith.constant 0 : index
    %c0_15 = arith.constant 0 : index
    %14 = vector.load %arg4[%c1, %c0_14, %c0_15] : memref<3x4x64xf32, #tpu.memory_space<vmem>>, vector<1x4x64xf32>
    %15 = vector.shape_cast %14 : vector<1x4x64xf32> to vector<4x64xf32>
    %c1_16 = arith.constant 1 : index
    %c0_17 = arith.constant 0 : index
    %c0_18 = arith.constant 0 : index
    %16 = vector.load %arg5[%c1_16, %c0_17, %c0_18] : memref<3x4x1xf32, #tpu.memory_space<vmem>>, vector<1x4x1xf32>
    %17 = vector.shape_cast %16 : vector<1x4x1xf32> to vector<4x1xf32>
    %cst_19 = arith.constant dense<0.000000e+00> : vector<4x64xf32>
    %18 = tpu.matmul %15, %13, %cst_19 {dimension_numbers = #tpu.dot_dimension_numbers<[1], [0], [0], [1], [0, 0, 1, 1], [], []>} : vector<4x64xf32>, vector<64x64xf32>, vector<4x64xf32> -> vector<4x64xf32>
    %19 = vector.broadcast %17 : vector<4x1xf32> to vector<4x64xf32>
    %20 = arith.addf %18, %19 : vector<4x64xf32>
    %c0_20 = arith.constant 0 : index
    %c0_21 = arith.constant 0 : index
    %c256 = arith.constant 256 : index
    %21 = vector.load %arg6[%c0_20, %c0_21, %c256] : memref<1x4x512xf32, #tpu.memory_space<vmem>>, vector<1x4x64xf32>
    %22 = vector.shape_cast %21 : vector<1x4x64xf32> to vector<4x64xf32>
    %23 = vector.shape_cast %20 : vector<4x64xf32> to vector<1x4x64xf32>
    tpu.vector_store %arg6[%c0_20, %c0_21, %c256], %23 {strides = array<i32>} : memref<1x4x512xf32, #tpu.memory_space<vmem>>, vector<1x4x64xf32>,
    %c0_22 = arith.constant 0 : index
    %c0_23 = arith.constant 0 : index
    %c0_24 = arith.constant 0 : index
    %24 = vector.load %arg3[%c0_22, %c0_23, %c0_24] : memref<1x64x16xf32, #tpu.memory_space<vmem>>, vector<1x64x16xf32>
    %25 = vector.shape_cast %24 : vector<1x64x16xf32> to vector<64x16xf32>
    %c2 = arith.constant 2 : index
    %c0_25 = arith.constant 0 : index
    %c0_26 = arith.constant 0 : index
    %26 = vector.load %arg4[%c2, %c0_25, %c0_26] : memref<3x4x64xf32, #tpu.memory_space<vmem>>, vector<1x4x64xf32>
    %27 = vector.shape_cast %26 : vector<1x4x64xf32> to vector<4x64xf32>
    %c2_27 = arith.constant 2 : index
    %c0_28 = arith.constant 0 : index
    %c0_29 = arith.constant 0 : index
    %28 = vector.load %arg5[%c2_27, %c0_28, %c0_29] : memref<3x4x1xf32, #tpu.memory_space<vmem>>, vector<1x4x1xf32>
    %29 = vector.shape_cast %28 : vector<1x4x1xf32> to vector<4x1xf32>
    %cst_30 = arith.constant dense<0.000000e+00> : vector<4x16xf32>
    %30 = tpu.matmul %27, %25, %cst_30 {dimension_numbers = #tpu.dot_dimension_numbers<[1], [0], [0], [1], [0, 0, 1, 1], [], []>} : vector<4x64xf32>, vector<64x16xf32>, vector<4x16xf32> -> vector<4x16xf32>
    %31 = vector.broadcast %29 : vector<4x1xf32> to vector<4x16xf32>
    %32 = arith.addf %30, %31 : vector<4x16xf32>
    %c0_31 = arith.constant 0 : index
    %c0_32 = arith.constant 0 : index
    %c384 = arith.constant 384 : index
    %33 = vector.load %arg6[%c0_31, %c0_32, %c384] : memref<1x4x512xf32, #tpu.memory_space<vmem>>, vector<1x4x16xf32>
    %34 = vector.shape_cast %33 : vector<1x4x16xf32> to vector<4x16xf32>
    %35 = vector.shape_cast %32 : vector<4x16xf32> to vector<1x4x16xf32>
    tpu.vector_store %arg6[%c0_31, %c0_32, %c384], %35 {strides = array<i32>} : memref<1x4x512xf32, #tpu.memory_space<vmem>>, vector<1x4x16xf32>,
    return
  }
  func.func @transform_0(%arg0: i32) -> (i32, i32, i32) {
    %c0_i32 = arith.constant 0 : i32
    %c0_i32_0 = arith.constant 0 : i32
    %c0_i32_1 = arith.constant 0 : i32
    return %arg0, %c0_i32, %c0_i32_0 : i32, i32, i32
  }
  func.func @transform_1(%arg0: i32) -> (i32, i32, i32) {
    %c0_i32 = arith.constant 0 : i32
    %c0_i32_0 = arith.constant 0 : i32
    %c0_i32_1 = arith.constant 0 : i32
    return %arg0, %c0_i32, %c0_i32_0 : i32, i32, i32
  }
  func.func @transform_2(%arg0: i32) -> (i32, i32, i32) {
    %c0_i32 = arith.constant 0 : i32
    %c0_i32_0 = arith.constant 0 : i32
    %c0_i32_1 = arith.constant 0 : i32
    return %arg0, %c0_i32, %c0_i32_0 : i32, i32, i32
  }
  func.func @transform_3(%arg0: i32) -> (i32, i32, i32) {
    %c0_i32 = arith.constant 0 : i32
    %c0_i32_0 = arith.constant 0 : i32
    %c0_i32_1 = arith.constant 0 : i32
    %c0_i32_2 = arith.constant 0 : i32
    return %c0_i32, %c0_i32_0, %c0_i32_1 : i32, i32, i32
  }
  func.func @transform_4(%arg0: i32) -> (i32, i32, i32) {
    %c0_i32 = arith.constant 0 : i32
    %c0_i32_0 = arith.constant 0 : i32
    %c0_i32_1 = arith.constant 0 : i32
    %c0_i32_2 = arith.constant 0 : i32
    return %c0_i32, %c0_i32_0, %c0_i32_1 : i32, i32, i32
  }
  func.func @transform_5(%arg0: i32) -> (i32, i32, i32) {
    %c0_i32 = arith.constant 0 : i32
    %c0_i32_0 = arith.constant 0 : i32
    %c0_i32_1 = arith.constant 0 : i32
    return %arg0, %c0_i32, %c0_i32_0 : i32, i32, i32
  }
}

</mosaic_0001>

<bundles_post_ra>
// kernel: tpu_custom_call.1
= control target key start
LH: loop header
LB: loop body
LE: loop exit
PB: predicated region body
PF: predicated region fallthrough
CT: control target
= control target key end

     0   :  { %10 = vsyncpa [#allocation3], 0  ;;  %s1242_s0 = inlined_call_operand.hbm [shape: f32[2,64,256], index: 0, kind: input, shape index: {}]   ;;  %s1243_s1 = inlined_call_operand.vmem [shape: f32[2,64,64], index: 1, kind: input, shape index: {}]   ;;  %s1244_s2 = inlined_call_operand.vmem [shape: f32[2,64,16], index: 2, kind: input, shape index: {}]   ;;  %s1245_s3 = inlined_call_operand.vmem [shape: f32[3,4,64], index: 3, kind: input, shape index: {}]   ;;  %s1246_s4 = inlined_call_operand.vmem [shape: f32[3,4,1], index: 4, kind: input, shape index: {}]   ;;  %s1247_s5 = inlined_call_operand.hbm [shape: f32[2,4,512], index: 5, kind: output, shape index: {}]  }
   0x1   :  { %12 = vsyncpa [#allocation3 + $0x1], 0 }
   0x2   :  { %13 = vsyncpa [#allocation4], 0 }
   0x3   :  { %15 = vsyncpa [#allocation4 + $0x1], 0  ;;  %s994_s18 = smov 0   ;;  %s996_s19 = smov 0  }
   0x4   :  { %s998_s20 = smov 0   ;;  %s1000_s21 = smov 0  }
   0x5 LB: > { %s1015_s22 = sadd.s32 4294967295, %s954_s21   ;;  %s679_s23 = sadd.s32 4294967294, %s954_s21   ;;  %s954_s21 = sphi %s1000_s21, %s1260_s21   ;;  %s950_s20 = sphi %s998_s20, %s1259_s20   ;;  %s946_s19 = sphi %s996_s19, %s1258_s19   ;;  %s942_s18 = sphi %s994_s18, %s1257_s18  }
   0x6   : > { %s1019_s24 = sadd.s32 1, %s954_s21   ;;  %s28_s25 = sadd.s32 1, %s950_s20 }
   0x7   : > { %s25_s26 = ssub.s32 %s954_s21, %s1019_s24  ;;  %p35_p0 = scmp.ne.s32.totalorder %s950_s20, %s946_s19 }
   0x8   : > { %p26_p1 = scmp.eq.s32.totalorder %s25_s26, 0  ;;  %p36_p2 = scmp.eq.s32.totalorder %s954_s21, 0 }
   0x9   : > { %p41_p3 = scmp.ne.s32.totalorder %s946_s19, %s942_s18  ;;  %p42_p4 = scmp.eq.s32.totalorder %s1015_s22, 0 }
   0xa   : > { %s1031_s27 = scalar_select %p26_p1, %s950_s20, %s28_s25  }
   0xb   : > { %p1033_p5 = por %p36_p2, %p35_p0  ;;  %p1037_p6 = por %p42_p4, %p41_p3 }
   0xc   : > { %p159_p7 = scmp.eq.s32.totalorder %s1015_s22, 1  ;;  %p165_p8 = scmp.eq.s32.totalorder %s679_s23, 1 }
   0xd   : > { %p816_p10 = scmp.lt.s32.totalorder %s954_s21, 2  ;;  %s191_s7 = sand.u32 1, %s950_s20  }
   0xe   : > { %p1044_p11 = por %p159_p7, %p35_p0  ;;  %p1048_p12 = por %p165_p8, %p41_p3 }
   0xf   : > { %s704_s8 = sshll.u32 %s954_s21, 11  ;;  %s682_s9 = sshll.u32 %s191_s7, 7 }
  0x10   : > { %s1251_s30 = scalar_select %p1044_p11, 1, 0 }
  0x11   : > { %s1252_s6 = scalar_select %p1048_p12, 1, 0 }
  0x12   : > { %s1057_s12 = scalar_lea.hbm %s1242_s0, %s704_s8  ;;  %s195_s13 = scalar_lea.vmem [#allocation2], %s682_s9 }
  0x13   : > { %s202_s14 = sshll.u32 %s195_s13, 4  ;;  %p1061_p13 = pnand %p816_p10, %p1033_p5  ;;  %s1065_s14 = int_to_ptr.vmem [resolvable:$true] %s202_s14 }
  0x14   : > { %s1067_s16 = scalar_lea.sflag [#allocation3], %s191_s7  ;;  %s858_s17 = scalar_lea.hbm %s1057_s12, 2048 }
  0x15   : > { %p859_p0 = scmp.ne.s32.totalorder %s1057_s12, %s858_s17  ;;  %p860_p1 = pneg %p1061_p13 }
  0x16   : > { %s863_s26 = scalar_lea.hbm %s1242_s0, 4096  ;;  %p864_p4 = scmp.lt.u32.totalorder %s1057_s12, %s1242_s0 }
  0x17   : > { %p861_p2 = pnand %p860_p1, %p859_p0  ;;  %p865_p5 = scmp.lt.u32.totalorder %s863_s26, %s858_s17 }
  0x18   : > { %p867_p8 = scmp.lt.u32.totalorder %s858_s17, %s1057_s12 }
  0x19   : > { %p862_p3 = pneg %p861_p2  ;;  %p866_p7 = por %p865_p5, %p864_p4 }
  0x1b   : > { %p868_p10 = por %p867_p8, %p866_p7 }
  0x1d   : > { %p869_p9 = pnand %p868_p10, %p862_p3 }
  0x1f   : > { %872 = shalt.err (!%p869_p9)
}
  0x20   : > { %s873_s7 = scalar_lea.vmem %s1065_s14, 2048  ;;  %s956_s9 = smov [#allocation2]  }
  0x21   : > { %p874_p0 = scmp.ne.s32.totalorder %s1065_s14, %s873_s7  ;;  %s878_s10 = sshll.u32 %s956_s9, 4  ;;  %s879_s10 = int_to_ptr.vmem [resolvable:$false] %s878_s10 }
  0x22   : > { %s880_s11 = scalar_lea.vmem %s879_s10, 4096  ;;  %p881_p11 = scmp.lt.s32.totalorder %s1065_s14, %s879_s10 }
  0x23   : > { %p876_p2 = pnand %p874_p0, %p860_p1  ;;  %p882_p4 = scmp.lt.s32.totalorder %s880_s11, %s873_s7 }
  0x25   : > { %p877_p12 = pneg %p876_p2  ;;  %p883_p5 = por %p882_p4, %p881_p11 }
  0x27   : > { %p884_p7 = pnand %p883_p5, %p877_p12 }
  0x29   : > { %887 = shalt.err (!%p884_p7)
}
  0x2a   : > { %s957_s13 = smov 256   ;;  %s958_s17 = smov 16  }
  0x2b   : > { %811 = dma.hbm_to_vmem [thread:$0]  (!%p1061_p13), %s1057_s12, 2048, %s1065_s14, %s1067_s16, %s957_s13, %s957_s13, %s958_s17  }
  0x2c   : > { %p685_p9 = scmp.ge.s32.totalorder %s954_s21, 1  ;;  %p226_p1 = scmp.lt.s32.totalorder %s954_s21, 3 }
  0x2e   : > { %p227_p3 = pnand %p685_p9, %p226_p1 }
  0x2f   : > { %s1098_s23 = sand.u32 (!%p227_p3), 1, %s946_s19  }
  0x30   : > { %230 = sbr.rel (%p227_p3) target bundleno = 320 (0x140), region = 40  ;;  %s686_s25 = sshll.u32 (!%p227_p3), %s1098_s23, 7 }
  0x31   : > { %s233_s26 = scalar_lea.sflag (!%p227_p3), [#allocation3], %s1098_s23  ;;  %s1102_s28 = scalar_lea.vmem (!%p227_p3), [#allocation2], %s686_s25 }
  0x37   : > { %933 = dma.done.wait (%p1037_p6), %s233_s26, 2048  }
  0x38   : > { %935 = vsyncadd (%p1037_p6), %s233_s26, 4294965248  ;;  %p273_p11 = scmp.lt.s32.totalorder %s1015_s22, 1  ;;  %v959_v0 = vmov 0.0|0.0   ;;  %v960_v1 = vmov 0.0   ;;  %vm961_vm0 = vmmov 0   ;;  %v962_v2 = vmov 0  }
  0x39   : > { %780 = vmatprep.subr.bf16.mxu1 %v959_v0  ;;  %374 = vmatprep.mubr.f32.mxu0 %v960_v1  ;;  %v284_v3 = vld [vmem:[%s1102_s28 + $0x8] sm:$0xff]  ;;  %v286_v4 = vld [vmem:[%s1102_s28 + $0x18] sm:$0xff]  ;;  %v283_v5 = vld [vmem:[%s1102_s28] sm:$0xff]  ;;  %vm306_vm1 = vcmask 523264   ;;  %s687_s8 = sshll.u32 %s1098_s23, 4  ;;  %vm476_vm2 = vcmask 519168  }
  0x3a   : > { %s1112_s12 = scalar_select %p273_p11, %s1015_s22, 1  ;;  %742 = vmatprep.mubr.msk.f32.mxu1 %vm961_vm0, %v960_v1  ;;  %856 = vset.pattern.permute.xlu0 %v962_v2  ;;  %v764_v6 = vpack.c.bf16 %v286_v4, %v284_v3  ;;  %v285_v7 = vld [vmem:[%s1102_s28 + $0x10] sm:$0xff]  ;;  %v288_v8 = vld [vmem:[%s1102_s28 + $0x28] sm:$0xff]  ;;  %v290_v9 = vld [vmem:[%s1102_s28 + $0x38] sm:$0xff]  ;;  %vm568_vm3 = vcmask 125952  }
  0x3b   : > { %857 = vset.pattern.permute.xlu1 %v962_v2  ;;  %v766_v10 = vpack.c.bf16 %v285_v7, %v283_v5  ;;  %v768_v11 = vpack.c.bf16 %v290_v9, %v288_v8  ;;  %v287_v12 = vld [vmem:[%s1102_s28 + $0x20] sm:$0xff]  ;;  %v289_v13 = vld [vmem:[%s1102_s28 + $0x30] sm:$0xff]  ;;  %v292_v14 = vld [vmem:[%s1102_s28 + $0x48] sm:$0xff]  ;;  %s272_s7 = scalar_lea.vmem [#allocation5], %s687_s8  ;;  %s571_s25 = scalar_lea.sflag [#allocation4], %s1098_s23 }
  0x3c   : > { %s705_s29 = sshll.u32 %s1112_s12, 6  ;;  %765 = vmatprep.subr.bf16.mxu0 %v764_v6  ;;  %v294_v15 = vld [vmem:[%s1102_s28 + $0x58] sm:$0xff]  ;;  %v770_v16 = vpack.c.bf16 %v289_v13, %v287_v12  ;;  %v291_v17 = vld [vmem:[%s1102_s28 + $0x40] sm:$0xff]  ;;  %v293_v18 = vld [vmem:[%s1102_s28 + $0x50] sm:$0xff]  ;;  %s585_s10 = sshll.u32 %s272_s7, 4  ;;  %s1200_s10 = int_to_ptr.vmem [resolvable:$true] %s585_s10 }
  0x3d   : > { %s1131_s16 = scalar_lea.vmem %s1243_s1, %s705_s29  ;;  %767 = vmatpush1.bf16.msra.mxu0 %v766_v10  ;;  %v772_v19 = vpack.c.bf16 %v294_v15, %v292_v14  ;;  %v296_v20 = vld [vmem:[%s1102_s28 + $0x68] sm:$0xff]  ;;  %v298_v23 = vld [vmem:[%s1102_s28 + $0x78] sm:$0xff]  ;;  %v774_v27 = vpack.c.bf16 %v293_v18, %v291_v17  ;;  %v295_v28 = vld [vmem:[%s1102_s28 + $0x60] sm:$0xff]  ;;  %s1149_s9 = scalar_lea.vmem %s1244_s2, %s705_s29 }
  0x3e   : > { %769 = vmatprep.subr.bf16.mxu0 %v768_v11  ;;  %v386_v21 = vld [vmem:[%s1131_s16] sm:$0xff]  ;;  %v387_v22 = vld [vmem:[%s1131_s16 + $0x8] sm:$0xff]  ;;  %v388_v25 = vld [vmem:[%s1131_s16 + $0x10] sm:$0xff]  ;;  %v776_v30 = vpack.c.bf16 %v298_v23, %v296_v20  ;;  %s888_s26 = scalar_lea.vmem %s1200_s10, 256  ;;  %p1254_p12 = scmp.ne.s32.totalorder %s1251_s30, 0 }
  0x3f   : > { %v781_v24 = vpack.c.bf16 %v387_v22, %v386_v21  ;;  %v389_v26 = vld [vmem:[%s1131_s16 + $0x18] sm:$0xff]  ;;  %v297_v31 = vld [vmem:[%s1102_s28 + $0x70] sm:$0xff]  ;;  %v390_v32 = vld [vmem:[%s1131_s16 + $0x20] sm:$0xff]  ;;  %p889_p6 = scmp.ne.s32.totalorder %s1200_s10, %s888_s26 }
  0x40   : > { %v784_v29 = vpack.c.bf16 %v389_v26, %v388_v25  ;;  %v391_v33 = vld [vmem:[%s1131_s16 + $0x28] sm:$0xff]  ;;  %v300_v34 = vld [vmem:[%s1246_s4] sm:$0xf]  ;;  %v778_v35 = vpack.c.bf16 %v297_v31, %v295_v28  ;;  %v392_v40 = vld [vmem:[%s1131_s16 + $0x30] sm:$0xff] }
  0x41   : > { %771 = vmatpush1.bf16.msra.mxu0 %v770_v16  ;;  %782 = vmatpush3.bf16.msra.mxu1 %v781_v24  ;;  %v478_v36 = vld [vmem:[%s1149_s9] sm:$0xff]  ;;  %v787_v37 = vpack.c.bf16 %v391_v33, %v390_v32  ;;  %v697_v38 = vld [vmem:[%s1246_s4 + $0x8] sm:$0xf]  ;;  %v393_v41 = vld [vmem:[%s1131_s16 + $0x38] sm:$0xff]  ;;  %p890_p13 = pnand %p889_p6, %p1254_p12 }
  0x42   : > { %773 = vmatprep.subr.bf16.mxu0 %v772_v19  ;;  %783 = vmatprep.subr.bf16.mxu1 %v959_v0  ;;  %v479_v39 = vld [vmem:[%s1149_s9 + $0x8] sm:$0xff]  ;;  %v694_v42 = vld [vmem:[%s1246_s4 + $0x4] sm:$0xf]  ;;  %v299_v43 = vld [vmem:[%s1245_s3] sm:$0xf]  ;;  %v790_v45 = vpack.c.bf16 %v393_v41, %v392_v40 }
  0x43   : > { %303 = vperm.xlu0 %856, %v300_v34   ;;  %492 = vperm.xlu1 %857, %v697_v38   ;;  %v793_v44 = vpack.c.bf16 %v479_v39, %v478_v36  ;;  %v480_v46 = vld [vmem:[%s1149_s9 + $0x10] sm:$0xff]  ;;  %v481_v47 = vld [vmem:[%s1149_s9 + $0x18] sm:$0xff]  ;;  %v693_v49 = vld [vmem:[%s1245_s3 + $0x4] sm:$0xf]  ;;  %p891_p8 = pneg %p890_p13 }
  0x44   : > { %v796_v48 = vpack.c.bf16 %v481_v47, %v480_v46  ;;  %v482_v50 = vld [vmem:[%s1149_s9 + $0x20] sm:$0xff]  ;;  %v483_v51 = vld [vmem:[%s1149_s9 + $0x28] sm:$0xff]  ;;  %v484_v53 = vld [vmem:[%s1149_s9 + $0x30] sm:$0xff] }
  0x45   : > { %775 = vmatpush1.bf16.msra.mxu0 %v774_v27  ;;  %785 = vmatpush3.bf16.msra.mxu1 %v784_v29  ;;  %v799_v52 = vpack.c.bf16 %v483_v51, %v482_v50  ;;  %v485_v54 = vld [vmem:[%s1149_s9 + $0x38] sm:$0xff]  ;;  %v696_v56 = vld [vmem:[%s1245_s3 + $0x8] sm:$0xf]  ;;  %s707_s9 = sshll.u32 %s1015_s22, 8  ;;  %s963_s22 = smov [#allocation5]  }
  0x46   : > { %777 = vmatprep.subr.bf16.mxu0 %v776_v30  ;;  %786 = vmatprep.subr.bf16.mxu1 %v959_v0  ;;  %v802_v55 = vpack.c.bf16 %v485_v54, %v484_v53  ;;  %s1198_s17 = scalar_lea.hbm %s1247_s5, %s707_s9  ;;  %s892_s28 = sshll.u32 %s963_s22, 4  ;;  %s893_s28 = int_to_ptr.vmem [resolvable:$false] %s892_s28 }
  0x47   : > { %400 = vperm.xlu0 %856, %v694_v42   ;;  %s894_s12 = scalar_lea.vmem %s893_s28, 512  ;;  %p895_p10 = scmp.lt.s32.totalorder %s1200_s10, %s893_s28 }
  0x48   : > { %p896_p0 = scmp.lt.s32.totalorder %s894_s12, %s888_s26 }
  0x49   : > { %779 = vmatpush1.bf16.msra.mxu0 %v778_v35  ;;  %788 = vmatpush3.bf16.msra.mxu1 %v787_v37 }
  0x4a   : > { %792 = vmatprep.subr.bf16.mxu0 %v959_v0  ;;  %789 = vmatprep.subr.bf16.mxu1 %v959_v0  ;;  %p897_p2 = por %p896_p0, %p895_p10 }
  0x4c   : > { %692 = vmatmul.mubr.msk.f32.vlgmr.msra.gmra.mrb[0].mxu0 %vm306_vm1, %v299_v43  ;;  %p898_p4 = pnand %p897_p2, %p891_p8 }
  0x4d   : > { %794 = vmatpush3.bf16.msra.mxu0 %v793_v44  ;;  %791 = vmatpush3.bf16.msra.mxu1 %v790_v45 }
  0x4e   : > { %795 = vmatprep.subr.bf16.mxu0 %v959_v0  ;;  %761 = vmatprep.mubr.msk.f32.mxu0 %vm961_vm0, %v960_v1 }
  0x50   : > { %743 = vmatmul.mubr.msk.f32.vlgmr.msra.gmra.mrb[0].mxu1 %vm306_vm1, %v693_v49 }
  0x51   : > { %797 = vmatpush3.bf16.msra.mxu0 %v796_v48 }
  0x52   : > { %798 = vmatprep.subr.bf16.mxu0 %v959_v0 }
  0x55   : > { %800 = vmatpush3.bf16.msra.mxu0 %v799_v52 }
  0x56   : > { %801 = vmatprep.subr.bf16.mxu0 %v959_v0 }
  0x59   : > { %803 = vmatpush3.bf16.msra.mxu0 %v802_v55 }
  0x5c   : > { %762 = vmatmul.mubr.msk.f32.vlgmr.msra.gmra.mrb[2].mxu0 %vm306_vm1, %v696_v56 }
  0xc2   : > { %v304_v57 = vpop.permute.xlu0 %303  ;;  %v493_v3 = vpop.permute.xlu1 %492 }
  0xc6   : > { %v401_v62 = vpop.permute.xlu0 %400 }
 0x11f   : > { %v376_v58 = vpop.f32.mrb[0].mxu0 }
 0x120   : > { %v377_v59 = vadd.f32 %v376_v58, %v304_v57  ;;  %v378_v60 = vpop.f32.mrb[1].mxu0 }
 0x121   : > { %v379_v61 = vadd.f32 %v378_v60, %v304_v57 }
 0x123   : > { %v383_v63 = vcombine.low %v377_v59, %v379_v61  ;;  %v472_v1 = vpop.f32.mrb[0].mxu1 }
 0x124   : > { %v473_v0 = vadd.f32 %v472_v1, %v401_v62  ;;  %v744_v2 = vpop.f32.mrb[1].mxu1 }
 0x125   : > { %385 = vst [vmem:[%s272_s7] sm:$0xff] %v383_v63 }
 0x126   : > { %477 = vst.msk [vmem:[%s272_s7 + $0x8] sm:$0xf] %vm476_vm2, %v473_v0 }
 0x12f   : > { %v564_v4 = vpop.f32.mrb[2].mxu0 }
 0x130   : > { %v565_v5 = vadd.f32 %v564_v4, %v493_v3  ;;  %v763_v6 = vpop.f32.mrb[3].mxu0 }
 0x132   : > { %569 = vst.msk [vmem:[%s272_s7 + $0xc] sm:$0xf] %vm568_vm3, %v565_v5 }
 0x133   : > { %901 = shalt.err (!%p898_p4)
}
 0x134   : > { %s902_s23 = scalar_lea.hbm %s1198_s17, 256  ;;  %s906_s15 = scalar_lea.hbm %s1247_s5, 512 }
 0x135   : > { %p903_p5 = scmp.ne.s32.totalorder %s1198_s17, %s902_s23  ;;  %p907_p1 = scmp.lt.u32.totalorder %s1198_s17, %s1247_s5 }
 0x136   : > { %p908_p3 = scmp.lt.u32.totalorder %s906_s15, %s902_s23  ;;  %p910_p6 = scmp.lt.u32.totalorder %s902_s23, %s1198_s17 }
 0x137   : > { %p904_p7 = pnand %p903_p5, %p1254_p12 }
 0x138   : > { %p909_p11 = por %p908_p3, %p907_p1 }
 0x139   : > { %p905_p9 = pneg %p904_p7 }
 0x13a   : > { %p911_p13 = por %p910_p6, %p909_p11 }
 0x13c   : > { %p912_p8 = pnand %p911_p13, %p905_p9 }
 0x13e   : > { %915 = shalt.err (!%p912_p8)
}
 0x13f   : > { %806 = dma.vmem_to_hbm [thread:$0]  (%p1254_p12), %s1200_s10, 256, %s1198_s17, %s571_s25  }
 0x140 PF: > { %s597_s7 = sand.u32 1, %s942_s18   ;;  %p1255_p10 = scmp.ne.s32.totalorder %s1252_s6, 0 }
 0x141   : > { %p1256_p0 = scmp.ge.s32.totalorder %s954_s21, 2  ;;  %s598_s9 = scalar_lea.sflag [#allocation4], %s597_s7 }
 0x143   : > { %p813_p2 = pnand %p1256_p0, %p1255_p10 }
 0x145   : > { %937 = dma.done.wait (!%p813_p2), %s598_s9, 256  }
 0x146   : > { %939 = vsyncadd (!%p813_p2), %s598_s9, 4294967040  ;;  %p18_p4 = scmp.ge.s32.totalorder %s1019_s24, 4   ;;  %s1257_s18 = smov %s946_s19 }
 0x147   : > { %s1258_s19 = smov %s950_s20  ;;  %s1259_s20 = smov %s1031_s27 }
 0x148   : > { %s1260_s21 = smov %s1019_s24  ;;  %20 = sbr.rel (!%p18_p4) target bundleno = 5 (0x5), region = 95 }
 0x14f   :  { %603 = vsyncpa [#allocation3], 1 }
 0x150   :  { %605 = vsyncpa [#allocation3 + $0x1], 1 }
 0x151   :  { %606 = vsyncpa [#allocation4], 1 }
 0x152   :  { %608 = vsyncpa [#allocation4 + $0x1], 1 }

</bundles_post_ra>
